<compile_context>
chip_gen: v5e
topology: v5e:2x2
jax: 0.10.0
libtpu: 0.0.40
codegen_flags: <defaults>
</compile_context>

<pallas_src>
import functools
import numpy as np
import jax
import jax.numpy as jnp
from jax import lax
from jax.experimental import pallas as pl
from jax.experimental.pallas import tpu as pltpu

GN_EPS = 1e-5            # PyTorch GroupNorm default eps
GROUPS = 8
ACT_DTYPE = jnp.bfloat16  # HBM activation / conv-weight dtype (MXU-native)


# ---------------------------------------------------------------------------
# In-kernel helpers (traced inside the Pallas kernels)
# ---------------------------------------------------------------------------
def _col_masks(H, W):
    """(HW, 1) validity masks for the dw=-1 / dw=+1 conv taps.

    Row (dh) overflow is handled exactly by the zero margins of the scratch
    slab, so only these two column-wrap masks are needed (9 masks -> 2)."""
    jj = lax.broadcasted_iota(jnp.int32, (H * W, 1), 0) % W
    return jj >= 1, jj < (W - 1)


def _zero_margins(xext_ref, M, HW):
    z = jnp.zeros((M, xext_ref.shape[-1]), xext_ref.dtype)
    xext_ref[:M, :] = z
    xext_ref[M + HW:, :] = z


def _conv3x3(xext_ref, w_ref, *, M, HW, W, cin, cmask_l, cmask_r):
    """3x3 'same' conv of the bf16 slab stored at xext_ref[M:M+HW, :cin].

    w_ref: (9*cin, cout) bf16 tap-major flattened HWIO weight.
    Shallow convs (cin <= 128) stack the three dw-taps of each dh row along K
    (one (HW, 3*cin) x (3*cin, cout) matmul) to raise MXU utilization; deep
    convs keep the 9-tap loop.  Returns the (HW, cout) f32 accumulator; the
    bias is NOT added here (it is folded into the GroupNorm affine)."""
    cout = w_ref.shape[-1]
    stack = cin <= 128
    acc = jnp.zeros((HW, cout), jnp.float32)
    for gi, dh in enumerate((-1, 0, 1)):
        wins = []
        for ti, dw in enumerate((-1, 0, 1)):
            off = dh * W + dw
            win = xext_ref[M + off:M + off + HW, :cin]   # bf16, no cast
            if dw < 0:
                win = jnp.where(cmask_l, win, 0)
            elif dw > 0:
                win = jnp.where(cmask_r, win, 0)
            if stack:
                wins.append(win)
            else:
                t = gi * 3 + ti
                acc = acc + jnp.dot(win, w_ref[t * cin:(t + 1) * cin, :],
                                    preferred_element_type=jnp.float32)
        if stack:
            acc = acc + jnp.dot(jnp.concatenate(wins, axis=-1),
                                w_ref[3 * gi * cin:3 * (gi + 1) * cin, :],
                                preferred_element_type=jnp.float32)
    return acc


def _gn_relu(y, bias, gamma, beta, G, GT, *, inv_count, hw, out_dtype):
    """GroupNorm(8, C) + ReLU with the conv bias and GN affine folded into a
    single per-channel scale/shift (out = max(y*a + s, 0)).

    y: (HW, C) f32 conv accumulator WITHOUT bias; bias/gamma/beta: (1, C) f32;
    G: (C, 8), GT: (8, C) group indicator matrices.  Stats stay f32, one-pass
    variance is clamped."""
    ch_sum = jnp.sum(y, axis=0, keepdims=True)                       # (1, C)
    ch_sq = jnp.sum(y * y, axis=0, keepdims=True)                    # (1, C)
    zsum = ch_sum + hw * bias                       # per-channel sums of y+b
    zsq = ch_sq + 2.0 * bias * ch_sum + hw * bias * bias
    mean_g = jnp.dot(zsum, G, preferred_element_type=jnp.float32) * inv_count
    ex2_g = jnp.dot(zsq, G, preferred_element_type=jnp.float32) * inv_count
    var_g = jnp.maximum(ex2_g - mean_g * mean_g, 0.0)
    inv_g = lax.rsqrt(var_g + GN_EPS)
    mean_c = jnp.dot(mean_g, GT, preferred_element_type=jnp.float32)
    inv_c = jnp.dot(inv_g, GT, preferred_element_type=jnp.float32)
    a = gamma * inv_c                                                # (1, C)
    s = (bias - mean_c) * a + beta                                   # (1, C)
    return jnp.maximum(y * a + s, 0.0).astype(out_dtype)


def _row_upsample2x(x):
    """Exact 2x bilinear (align_corners=False) upsample along axis 0 as a
    4-tap weighted add.  x: (h, W, C) f32 -> (2h, W, C) f32."""
    h, W, C = x.shape
    up = jnp.concatenate([x[:1], x[:-1]], axis=0)        # x[max(i-1, 0)]
    dn = jnp.concatenate([x[1:], x[-1:]], axis=0)        # x[min(i+1, h-1)]
    ev = 0.75 * x + 0.25 * up                            # output rows 2i
    od = 0.75 * x + 0.25 * dn                            # output rows 2i+1
    return jnp.concatenate([ev[:, None], od[:, None]],
                           axis=1).reshape(2 * h, W, C)


# ---------------------------------------------------------------------------
# Pallas kernels
# ---------------------------------------------------------------------------
def _mid_kernel(x_ref, w_ref, b_ref, g_ref, be_ref, G_ref, GT_ref,
                o_ref, xext_ref, *, H, W, inv_count):
    HW, M = H * W, W + 1
    cl, cr = _col_masks(H, W)
    _zero_margins(xext_ref, M, HW)
    xext_ref[M:M + HW, :] = x_ref[0]
    y = _conv3x3(xext_ref, w_ref, M=M, HW=HW, W=W, cin=x_ref.shape[-1],
                 cmask_l=cl, cmask_r=cr)
    o_ref[0] = _gn_relu(y, b_ref[...], g_ref[...], be_ref[...],
                        G_ref[...], GT_ref[...], inv_count=inv_count,
                        hw=float(HW), out_dtype=o_ref.dtype)


def _upblock_kernel(*refs, H, W, co, inv_count, with_tail):
    (xw_ref, prev_ref,
     w1x_ref, w1p_ref, b1_ref, g1_ref, be1_ref,
     w2_ref, b2_ref, g2_ref, be2_ref,
     w3_ref, b3_ref, g3_ref, be3_ref, G_ref, GT_ref) = refs[:17]
    if with_tail:
        wl1_ref, bl1_ref, gl1_ref, bel1_ref, wl2t_ref, bl2_ref = refs[17:23]
        o_ref, xext_ref = refs[23:25]
    else:
        o_ref, xext_ref = refs[17:19]

    HW, M = H * W, W + 1
    cx = xw_ref.shape[-1]             # upsampled-path channels (2*co)
    cp = prev_ref.shape[-1]           # skip-path channels (co)
    cl, cr = _col_masks(H, W)
    G, GT = G_ref[...], GT_ref[...]
    _zero_margins(xext_ref, M, HW)

    conv = functools.partial(_conv3x3, xext_ref, M=M, HW=HW, W=W,
                             cmask_l=cl, cmask_r=cr)
    gn = functools.partial(_gn_relu, G=G, GT=GT, inv_count=inv_count,
                           hw=float(HW), out_dtype=ACT_DTYPE)

    # Row half of the separable 2x bilinear upsample (the column half is a
    # tiny (2w, w) operator applied in the wrapper); exact 4-tap add, f32.
    xup = _row_upsample2x(xw_ref[0].astype(jnp.float32))          # (H, W, cx)
    xext_ref[M:M + HW, :cx] = xup.reshape(HW, cx).astype(xext_ref.dtype)

    # conv1 over the *virtual* concat([x_up, prev], channels): weight split
    # into x-rows / skip-rows, the concatenated tensor never materializes.
    acc = conv(w1x_ref, cin=cx)
    xext_ref[M:M + HW, :cp] = prev_ref[0]
    acc = acc + conv(w1p_ref, cin=cp)
    y = gn(acc, b1_ref[...], g1_ref[...], be1_ref[...])

    xext_ref[M:M + HW, :co] = y
    y = gn(conv(w2_ref, cin=co), b2_ref[...], g2_ref[...], be2_ref[...])

    xext_ref[M:M + HW, :co] = y
    y = gn(conv(w3_ref, cin=co), b3_ref[...], g3_ref[...], be3_ref[...])

    if not with_tail:
        o_ref[0] = y.astype(o_ref.dtype)
        return

    # Fused tail: last_conv1(3x3)+GN+ReLU then the 1x1 last_conv2+ReLU.  The
    # result is emitted channel-major (out_ch, HW) so the narrow (3-channel)
    # store is lane-dense instead of a masked partial store.
    xext_ref[M:M + HW, :co] = y
    y = gn(conv(wl1_ref, cin=co), bl1_ref[...], gl1_ref[...], bel1_ref[...])
    z = lax.dot_general(wl2t_ref[...], y, (((1,), (1,)), ((), ())),
                        preferred_element_type=jnp.float32)      # (out_ch, HW)
    o_ref[0] = jnp.maximum(z + bl2_ref[...], 0.0).astype(o_ref.dtype)


# ---------------------------------------------------------------------------
# Host-side constant builders & glue
# ---------------------------------------------------------------------------
def _bilinear_matrix(n_in):
    """1-D interpolation matrix of torch Upsample(scale=2, bilinear,
    align_corners=False): (2*n_in, n_in), float32 (kept exact)."""
    n_out = 2 * n_in
    m = np.zeros((n_out, n_in), np.float32)
    for o in range(n_out):
        src = max((o + 0.5) * 0.5 - 0.5, 0.0)
        x0 = min(int(np.floor(src)), n_in - 1)
        x1 = min(x0 + 1, n_in - 1)
        lam = src - x0
        m[o, x0] += 1.0 - lam
        m[o, x1] += lam
    return m


def _group_mats(c):
    gs = c // GROUPS
    G = (np.arange(c)[:, None] // gs ==
         np.arange(GROUPS)[None, :]).astype(np.float32)
    return jnp.asarray(G), jnp.asarray(np.ascontiguousarray(G.T))


def _prep_w3x3(w):
    kh, kw, cin, cout = w.shape
    return w.reshape(kh * kw * cin, cout).astype(ACT_DTYPE)


def _prep_vec(v):
    return v.reshape(1, -1).astype(jnp.float32)


def _vmem_limit_bytes():
    """Generation-aware VMEM budget: ~80% of physical capacity."""
    cap = 64 * 1024 * 1024
    try:
        cap = int(pltpu.get_tpu_info().vmem_capacity_bytes)
    except Exception:
        pass
    return int(cap * 0.8)


def _cparams():
    # TODO(synk): for the production downsample=6 config, add an HW-tile grid
    # axis with a +/-1-row halo and two-phase GroupNorm so whole-image slabs
    # never need to fit VMEM, and mark it "parallel" for megacore sharding.
    return pltpu.CompilerParams(dimension_semantics=("parallel",),
                                vmem_limit_bytes=_vmem_limit_bytes())


def _probe_kernel(x_ref, o_ref):
    o_ref[...] = x_ref[...]


@functools.cache
def _single_buffer_ok():
    """Probe once whether pipeline_mode=pl.Buffered(1) lowers on this backend."""
    try:
        f = pl.pallas_call(
            _probe_kernel,
            out_shape=jax.ShapeDtypeStruct((8, 128), jnp.float32),
            grid=(1,),
            in_specs=[pl.BlockSpec((8, 128), lambda i: (0, 0),
                                   pipeline_mode=pl.Buffered(1))],
            out_specs=pl.BlockSpec((8, 128), lambda i: (0, 0)))
        jax.block_until_ready(f(jnp.zeros((8, 128), jnp.float32)))
        return True
    except Exception:
        return False


def _const_spec(shape):
    """Grid-invariant operand (weights / biases / GN constants): full block,
    constant index_map, single-buffered so it is not duplicated in VMEM."""
    idx = lambda n: (0,) * len(shape)
    if _single_buffer_ok():
        return pl.BlockSpec(tuple(shape), idx, pipeline_mode=pl.Buffered(1))
    return pl.BlockSpec(tuple(shape), idx)


# ---------------------------------------------------------------------------
# pallas_call wrappers
# ---------------------------------------------------------------------------
def mid_conv_gn_relu(x_flat, H, W, w, b, gamma, beta):
    N, HW, C = x_flat.shape
    M = W + 1
    G, GT = _group_mats(C)
    args = (x_flat, _prep_w3x3(w), _prep_vec(b), _prep_vec(gamma),
            _prep_vec(beta), G, GT)
    kern = functools.partial(_mid_kernel, H=H, W=W,
                             inv_count=1.0 / (HW * (C // GROUPS)))
    in_specs = ([pl.BlockSpec((1, HW, C), lambda n: (n, 0, 0))] +
                [_const_spec(a.shape) for a in args[1:]])
    return pl.pallas_call(
        kern, out_shape=jax.ShapeDtypeStruct((N, HW, C), ACT_DTYPE),
        grid=(N,), in_specs=in_specs,
        out_specs=pl.BlockSpec((1, HW, C), lambda n: (n, 0, 0)),
        scratch_shapes=[pltpu.VMEM((HW + 2 * M, C), ACT_DTYPE)],
        compiler_params=_cparams())(*args)


def unet_up_block(blk, prev_nhwc, x_colup, tail=None):
    """Fused up block: in-kernel row-upsample of the column-upsampled x,
    conv1 over the virtual concat, conv2, conv3 (each +GroupNorm+ReLU).
    If `tail` is given (shallowest block), also fuses last_conv1+GN+ReLU and
    the 1x1 last_conv2+ReLU, returning (N, out_ch, HW) f32."""
    N, hh, W, Cx = x_colup.shape            # column-upsampled low-res input
    Np, H, Wp, Cp = prev_nhwc.shape         # skip map at the output resolution
    assert Np == N and H == 2 * hh and Wp == W
    HW, M = H * W, W + 1

    w1, b1 = blk['conv1']; w2, b2 = blk['conv2']; w3, b3 = blk['conv3']
    g1, be1 = blk['bn1']; g2, be2 = blk['bn2']; g3, be3 = blk['bn3']
    Co = w1.shape[-1]
    G, GT = _group_mats(Co)
    prev_flat = prev_nhwc.reshape(N, HW, Cp).astype(ACT_DTYPE)

    args = [x_colup.astype(ACT_DTYPE), prev_flat,
            _prep_w3x3(w1[:, :, :Cx, :]),   # conv1 rows acting on upsampled x
            _prep_w3x3(w1[:, :, Cx:, :]),   # conv1 rows acting on the skip map
            _prep_vec(b1), _prep_vec(g1), _prep_vec(be1),
            _prep_w3x3(w2), _prep_vec(b2), _prep_vec(g2), _prep_vec(be2),
            _prep_w3x3(w3), _prep_vec(b3), _prep_vec(g3), _prep_vec(be3),
            G, GT]

    with_tail = tail is not None
    if with_tail:
        assert Co == 16
        (wl1, bl1), (gl1, bel1), (wl2, bl2) = tail
        out_ch = wl2.shape[-1]
        wl2t = jnp.transpose(wl2.reshape(wl2.shape[2], wl2.shape[3])
                             ).astype(ACT_DTYPE)            # (out_ch, 16)
        args += [_prep_w3x3(wl1), _prep_vec(bl1), _prep_vec(gl1),
                 _prep_vec(bel1), wl2t,
                 bl2.reshape(-1, 1).astype(jnp.float32)]
        out_shape = jax.ShapeDtypeStruct((N, out_ch, HW), jnp.float32)
        out_spec = pl.BlockSpec((1, out_ch, HW), lambda n: (n, 0, 0))
    else:
        out_shape = jax.ShapeDtypeStruct((N, HW, Co), ACT_DTYPE)
        out_spec = pl.BlockSpec((1, HW, Co), lambda n: (n, 0, 0))

    kern = functools.partial(_upblock_kernel, H=H, W=W, co=Co,
                             inv_count=1.0 / (HW * (Co // GROUPS)),
                             with_tail=with_tail)
    in_specs = ([pl.BlockSpec((1, hh, W, Cx), lambda n: (n, 0, 0, 0)),
                 pl.BlockSpec((1, HW, Cp), lambda n: (n, 0, 0))] +
                [_const_spec(a.shape) for a in args[2:]])
    cmax = max(Cx, Cp, Co)
    return pl.pallas_call(
        kern, out_shape=out_shape, grid=(N,), in_specs=in_specs,
        out_specs=out_spec,
        scratch_shapes=[pltpu.VMEM((HW + 2 * M, cmax), ACT_DTYPE)],
        compiler_params=_cparams())(*args)


# ---------------------------------------------------------------------------
# Parameters & forward (matching the PyTorch module's structure)
# ---------------------------------------------------------------------------
def _init_conv(key, kh, kw, cin, cout):
    kw_, kb = jax.random.split(key)
    bound = 1.0 / np.sqrt(kh * kw * cin)
    w = jax.random.uniform(kw_, (kh, kw, cin, cout), jnp.float32, -bound, bound)
    b = jax.random.uniform(kb, (cout,), jnp.float32, -bound, bound)
    return w, b


def _init_gn(c):
    return jnp.ones((c,), jnp.float32), jnp.zeros((c,), jnp.float32)


def init_params(key, downsample=2, out_channel=3):
    bottleneck = 2 ** (4 + downsample)
    keys = iter(jax.random.split(key, 4 * downsample + 8))
    params = {
        'mid_conv3': _init_conv(next(keys), 3, 3, bottleneck, bottleneck),
        'bn3': _init_gn(bottleneck),
        'up_blocks': [],
        'last_bn': _init_gn(16),
    }
    for i in range(downsample):
        prev_c, in_c, out_c = 2 ** (4 + i), 2 ** (5 + i), 2 ** (4 + i)
        params['up_blocks'].append({
            # input-channel order of conv1 = [upsampled x (in_c), skip (prev_c)]
            'conv1': _init_conv(next(keys), 3, 3, in_c + prev_c, out_c),
            'bn1': _init_gn(out_c),
            'conv2': _init_conv(next(keys), 3, 3, out_c, out_c),
            'bn2': _init_gn(out_c),
            'conv3': _init_conv(next(keys), 3, 3, out_c, out_c),
            'bn3': _init_gn(out_c),
        })
    params['last_conv1'] = _init_conv(next(keys), 3, 3, 16, 16)
    params['last_conv2'] = _init_conv(next(keys), 1, 1, 16, out_channel)
    return params


def unet_ls_up_forward(params, xvals, x, downsample):
    """x: (N, h, w, 2**(4+downsample)) bottleneck map (NHWC); xvals[i]: skip
    map (N, base/2**i, base/2**i, 2**(4+i)) (NHWC).  Returns NCHW output,
    matching the PyTorch module."""
    assert downsample >= 1
    N, h, w, C = x.shape
    wm, bm = params['mid_conv3']
    gm, bem = params['bn3']
    # Inter-kernel activations are bf16 (halves HBM traffic); expect small
    # drift vs. an f32 torch reference.
    xf = mid_conv_gn_relu(x.reshape(N, h * w, C).astype(ACT_DTYPE),
                          h, w, wm, bm, gm, bem)
    cur_c = C
    for i in reversed(range(downsample)):
        # Separable bilinear 2x upsample: column (w) half here with a tiny
        # (2w, w) f32 operator (never the O((hw)^2) kron); row (h) half is a
        # 4-tap weighted add inside the up-block kernel.
        Uw = jnp.asarray(_bilinear_matrix(w), jnp.float32)
        x_colup = jnp.einsum('Ww,nhwc->nhWc', Uw,
                             xf.reshape(N, h, w, cur_c).astype(jnp.float32))
        tail = None
        if i == 0:   # fuse the tail with the shallowest (full-res) block
            tail = (params['last_conv1'], params['last_bn'],
                    params['last_conv2'])
        xf = unet_up_block(params['up_blocks'][i], xvals[i], x_colup,
                           tail=tail)
        h, w = 2 * h, 2 * w
        cur_c = params['up_blocks'][i]['conv1'][0].shape[-1]
    out_ch = params['last_conv2'][0].shape[-1]
    return xf.reshape(N, out_ch, h, w)   # NCHW (lane-dense store from kernel)


if __name__ == "__main__":
    downsample, out_channel = 2, 3       # small demo config (module default is 6)
    N, base_hw = 2, 16                   # output spatial resolution
    key = jax.random.PRNGKey(0)
    kp, kx = jax.random.split(key)
    params = init_params(kp, downsample, out_channel)

    ks = jax.random.split(kx, downsample + 1)
    hb = base_hw // (2 ** downsample)
    x_bottleneck = jax.random.normal(
        ks[0], (N, hb, hb, 2 ** (4 + downsample)), jnp.float32)
    xvals = [
        jax.random.normal(ks[i + 1],
                          (N, base_hw // (2 ** i), base_hw // (2 ** i),
                           2 ** (4 + i)), jnp.float32)
        for i in range(downsample)
    ]

    out = unet_ls_up_forward(params, xvals, x_bottleneck, downsample)
    out = jax.block_until_ready(out)
    assert out.shape == (N, out_channel, base_hw, base_hw), out.shape
    assert bool(jnp.all(jnp.isfinite(out)))
    print("KERNEL_OK")
</pallas_src>

<mosaic_0001>
module attributes {stable_mosaic.version = 11 : i64} {
  func.func @_probe_kernel(%arg0: i32, %arg1: memref<8x128xf32, #tpu.memory_space<vmem>>, %arg2: memref<8x128xf32, #tpu.memory_space<vmem>>) attributes {dimension_semantics = [#tpu.dimension_semantics<arbitrary>], iteration_bounds = array<i64: 1>, scalar_prefetch = 0 : i64, scratch_operands = 0 : i64, tpu.core_type = #tpu.core_type<tc>, window_params = [{pipeline_mode = #tpu.pipeline_mode<synchronous>, transform_indices = @transform_0, window_bounds = array<i64: 8, 128>}, {pipeline_mode = #tpu.pipeline_mode<synchronous>, transform_indices = @transform_1, window_bounds = array<i64: 8, 128>}]} {
    %c0 = arith.constant 0 : index
    %c0_0 = arith.constant 0 : index
    %0 = vector.load %arg1[%c0, %c0_0] : memref<8x128xf32, #tpu.memory_space<vmem>>, vector<8x128xf32>
    %c0_1 = arith.constant 0 : index
    %c0_2 = arith.constant 0 : index
    %1 = vector.load %arg2[%c0_1, %c0_2] : memref<8x128xf32, #tpu.memory_space<vmem>>, vector<8x128xf32>
    tpu.vector_store %arg2[%c0_1, %c0_2], %0 {strides = array<i32>} : memref<8x128xf32, #tpu.memory_space<vmem>>, vector<8x128xf32>,
    return
  }
  func.func @transform_0(%arg0: i32) -> (i32, i32) {
    %c0_i32 = arith.constant 0 : i32
    %c0_i32_0 = arith.constant 0 : i32
    %c0_i32_1 = arith.constant 0 : i32
    return %c0_i32, %c0_i32_0 : i32, i32
  }
  func.func @transform_1(%arg0: i32) -> (i32, i32) {
    %c0_i32 = arith.constant 0 : i32
    %c0_i32_0 = arith.constant 0 : i32
    %c0_i32_1 = arith.constant 0 : i32
    return %c0_i32, %c0_i32_0 : i32, i32
  }
}

module attributes {stable_mosaic.version = 11 : i64} {
  func.func @_mid_kernel(%arg0: i32, %arg1: memref<1x16x64xbf16, #tpu.memory_space<vmem>>, %arg2: memref<576x64xbf16, #tpu.memory_space<vmem>>, %arg3: memref<1x64xf32, #tpu.memory_space<vmem>>, %arg4: memref<1x64xf32, #tpu.memory_space<vmem>>, %arg5: memref<1x64xf32, #tpu.memory_space<vmem>>, %arg6: memref<64x8xf32, #tpu.memory_space<vmem>>, %arg7: memref<8x64xf32, #tpu.memory_space<vmem>>, %arg8: memref<1x16x64xbf16, #tpu.memory_space<vmem>>, %arg9: memref<26x64xbf16, #tpu.memory_space<vmem>>) attributes {dimension_semantics = [#tpu.dimension_semantics<parallel>], iteration_bounds = array<i64: 2>, scalar_prefetch = 0 : i64, scratch_operands = 1 : i64, tpu.core_type = #tpu.core_type<tc>, window_params = [{transform_indices = @transform_0, window_bounds = array<i64: 1, 16, 64>}, {pipeline_mode = #tpu.pipeline_mode<synchronous>, transform_indices = @transform_1, window_bounds = array<i64: 576, 64>}, {pipeline_mode = #tpu.pipeline_mode<synchronous>, transform_indices = @transform_2, window_bounds = array<i64: 1, 64>}, {pipeline_mode = #tpu.pipeline_mode<synchronous>, transform_indices = @transform_3, window_bounds = array<i64: 1, 64>}, {pipeline_mode = #tpu.pipeline_mode<synchronous>, transform_indices = @transform_4, window_bounds = array<i64: 1, 64>}, {pipeline_mode = #tpu.pipeline_mode<synchronous>, transform_indices = @transform_5, window_bounds = array<i64: 64, 8>}, {pipeline_mode = #tpu.pipeline_mode<synchronous>, transform_indices = @transform_6, window_bounds = array<i64: 8, 64>}, {transform_indices = @transform_7, window_bounds = array<i64: 1, 16, 64>}]} {
    %0 = tpu.iota {dimensions = array<i32: 0>} : vector<16x1xi32>
    %c4_i32 = arith.constant 4 : i32
    %c0_i32 = arith.constant 0 : i32
    %1 = arith.cmpi eq, %c4_i32, %c0_i32 : i32
    %c1_i32 = arith.constant 1 : i32
    %2 = arith.select %1, %c1_i32, %c4_i32 : i32
    %3 = vector.broadcast %2 : i32 to vector<16x1xi32>
    %4 = arith.remsi %0, %3 : vector<16x1xi32>
    %c0_i32_0 = arith.constant 0 : i32
    %5 = vector.broadcast %c0_i32_0 : i32 to vector<16x1xi32>
    %6 = arith.cmpi ne, %4, %5 : vector<16x1xi32>
    %c0_i32_1 = arith.constant 0 : i32
    %7 = vector.broadcast %c0_i32_1 : i32 to vector<16x1xi32>
    %8 = arith.cmpi slt, %4, %7 : vector<16x1xi32>
    %c0_i32_2 = arith.constant 0 : i32
    %9 = arith.cmpi slt, %2, %c0_i32_2 : i32
    %10 = vector.broadcast %9 : i1 to vector<16x1xi1>
    %11 = vector.broadcast %10 : vector<16x1xi1> to vector<16x1xi1>
    %12 = arith.xori %8, %11 : vector<16x1xi1>
    %13 = arith.andi %12, %6 : vector<16x1xi1>
    %14 = vector.broadcast %2 : i32 to vector<16x1xi32>
    %15 = arith.addi %4, %14 : vector<16x1xi32>
    %16 = arith.select %13, %15, %4 : vector<16x1xi1>, vector<16x1xi32>
    %c1_i32_3 = arith.constant 1 : i32
    %17 = vector.broadcast %c1_i32_3 : i32 to vector<16x1xi32>
    %18 = arith.cmpi sge, %16, %17 : vector<16x1xi32>
    %c3_i32 = arith.constant 3 : i32
    %19 = vector.broadcast %c3_i32 : i32 to vector<16x1xi32>
    %20 = arith.cmpi slt, %16, %19 : vector<16x1xi32>
    %cst = arith.constant 0.000000e+00 : bf16
    %21 = vector.broadcast %cst : bf16 to vector<5x64xbf16>
    %c0 = arith.constant 0 : index
    %c0_4 = arith.constant 0 : index
    %22 = vector.load %arg9[%c0, %c0_4] : memref<26x64xbf16, #tpu.memory_space<vmem>>, vector<5x64xbf16>
    tpu.vector_store %arg9[%c0, %c0_4], %21 {strides = array<i32>} : memref<26x64xbf16, #tpu.memory_space<vmem>>, vector<5x64xbf16>,
    %c21 = arith.constant 21 : index
    %c0_5 = arith.constant 0 : index
    %23 = vector.load %arg9[%c21, %c0_5] : memref<26x64xbf16, #tpu.memory_space<vmem>>, vector<5x64xbf16>
    tpu.vector_store %arg9[%c21, %c0_5], %21 {strides = array<i32>} : memref<26x64xbf16, #tpu.memory_space<vmem>>, vector<5x64xbf16>,
    %c0_6 = arith.constant 0 : index
    %c0_7 = arith.constant 0 : index
    %c0_8 = arith.constant 0 : index
    %24 = vector.load %arg1[%c0_6, %c0_7, %c0_8] : memref<1x16x64xbf16, #tpu.memory_space<vmem>>, vector<1x16x64xbf16>
    %25 = vector.shape_cast %24 : vector<1x16x64xbf16> to vector<16x64xbf16>
    %c5 = arith.constant 5 : index
    %c0_9 = arith.constant 0 : index
    %26 = vector.load %arg9[%c5, %c0_9] : memref<26x64xbf16, #tpu.memory_space<vmem>>, vector<16x64xbf16>
    tpu.vector_store %arg9[%c5, %c0_9], %25 {strides = array<i32>} : memref<26x64xbf16, #tpu.memory_space<vmem>>, vector<16x64xbf16>,
    %cst_10 = arith.constant 0.000000e+00 : f32
    %27 = vector.broadcast %cst_10 : f32 to vector<16x64xf32>
    %c0_11 = arith.constant 0 : index
    %c0_12 = arith.constant 0 : index
    %28 = vector.load %arg9[%c0_11, %c0_12] : memref<26x64xbf16, #tpu.memory_space<vmem>>, vector<16x64xbf16>
    %c0_i32_13 = arith.constant 0 : i32
    %29 = arith.sitofp %c0_i32_13 : i32 to bf16
    %30 = vector.shape_cast %18 : vector<16x1xi1> to vector<16x1xi1>
    %31 = vector.broadcast %30 : vector<16x1xi1> to vector<16x64xi1>
    %32 = vector.broadcast %29 : bf16 to vector<16x64xbf16>
    %33 = arith.select %31, %28, %32 : vector<16x64xi1>, vector<16x64xbf16>
    %c1 = arith.constant 1 : index
    %c0_14 = arith.constant 0 : index
    %34 = vector.load %arg9[%c1, %c0_14] : memref<26x64xbf16, #tpu.memory_space<vmem>>, vector<16x64xbf16>
    %c2 = arith.constant 2 : index
    %c0_15 = arith.constant 0 : index
    %35 = vector.load %arg9[%c2, %c0_15] : memref<26x64xbf16, #tpu.memory_space<vmem>>, vector<16x64xbf16>
    %c0_i32_16 = arith.constant 0 : i32
    %36 = arith.sitofp %c0_i32_16 : i32 to bf16
    %37 = vector.shape_cast %20 : vector<16x1xi1> to vector<16x1xi1>
    %38 = vector.broadcast %37 : vector<16x1xi1> to vector<16x64xi1>
    %39 = vector.broadcast %36 : bf16 to vector<16x64xbf16>
    %40 = arith.select %38, %35, %39 : vector<16x64xi1>, vector<16x64xbf16>
    %41 = tpu.concatenate %33, %34, %40 in 1 : vector<16x64xbf16>, vector<16x64xbf16>, vector<16x64xbf16> -> vector<16x192xbf16>
    %c0_17 = arith.constant 0 : index
    %c0_18 = arith.constant 0 : index
    %42 = vector.load %arg2[%c0_17, %c0_18] : memref<576x64xbf16, #tpu.memory_space<vmem>>, vector<192x64xbf16>
    %cst_19 = arith.constant dense<0.000000e+00> : vector<16x64xf32>
    %43 = tpu.matmul %41, %42, %cst_19 {dimension_numbers = #tpu.dot_dimension_numbers<[1], [0], [0], [1], [0, 0, 1, 1], [], []>} : vector<16x192xbf16>, vector<192x64xbf16>, vector<16x64xf32> -> vector<16x64xf32>
    %44 = arith.addf %27, %43 : vector<16x64xf32>
    %c4 = arith.constant 4 : index
    %c0_20 = arith.constant 0 : index
    %45 = vector.load %arg9[%c4, %c0_20] : memref<26x64xbf16, #tpu.memory_space<vmem>>, vector<16x64xbf16>
    %c0_i32_21 = arith.constant 0 : i32
    %46 = arith.sitofp %c0_i32_21 : i32 to bf16
    %47 = vector.shape_cast %18 : vector<16x1xi1> to vector<16x1xi1>
    %48 = vector.broadcast %47 : vector<16x1xi1> to vector<16x64xi1>
    %49 = vector.broadcast %46 : bf16 to vector<16x64xbf16>
    %50 = arith.select %48, %45, %49 : vector<16x64xi1>, vector<16x64xbf16>
    %c5_22 = arith.constant 5 : index
    %c0_23 = arith.constant 0 : index
    %51 = vector.load %arg9[%c5_22, %c0_23] : memref<26x64xbf16, #tpu.memory_space<vmem>>, vector<16x64xbf16>
    %c6 = arith.constant 6 : index
    %c0_24 = arith.constant 0 : index
    %52 = vector.load %arg9[%c6, %c0_24] : memref<26x64xbf16, #tpu.memory_space<vmem>>, vector<16x64xbf16>
    %c0_i32_25 = arith.constant 0 : i32
    %53 = arith.sitofp %c0_i32_25 : i32 to bf16
    %54 = vector.shape_cast %20 : vector<16x1xi1> to vector<16x1xi1>
    %55 = vector.broadcast %54 : vector<16x1xi1> to vector<16x64xi1>
    %56 = vector.broadcast %53 : bf16 to vector<16x64xbf16>
    %57 = arith.select %55, %52, %56 : vector<16x64xi1>, vector<16x64xbf16>
    %58 = tpu.concatenate %50, %51, %57 in 1 : vector<16x64xbf16>, vector<16x64xbf16>, vector<16x64xbf16> -> vector<16x192xbf16>
    %c192 = arith.constant 192 : index
    %c0_26 = arith.constant 0 : index
    %59 = vector.load %arg2[%c192, %c0_26] : memref<576x64xbf16, #tpu.memory_space<vmem>>, vector<192x64xbf16>
    %cst_27 = arith.constant dense<0.000000e+00> : vector<16x64xf32>
    %60 = tpu.matmul %58, %59, %cst_27 {dimension_numbers = #tpu.dot_dimension_numbers<[1], [0], [0], [1], [0, 0, 1, 1], [], []>} : vector<16x192xbf16>, vector<192x64xbf16>, vector<16x64xf32> -> vector<16x64xf32>
    %61 = arith.addf %44, %60 : vector<16x64xf32>
    %c8 = arith.constant 8 : index
    %c0_28 = arith.constant 0 : index
    %62 = vector.load %arg9[%c8, %c0_28] : memref<26x64xbf16, #tpu.memory_space<vmem>>, vector<16x64xbf16>
    %c0_i32_29 = arith.constant 0 : i32
    %63 = arith.sitofp %c0_i32_29 : i32 to bf16
    %64 = vector.shape_cast %18 : vector<16x1xi1> to vector<16x1xi1>
    %65 = vector.broadcast %64 : vector<16x1xi1> to vector<16x64xi1>
    %66 = vector.broadcast %63 : bf16 to vector<16x64xbf16>
    %67 = arith.select %65, %62, %66 : vector<16x64xi1>, vector<16x64xbf16>
    %c9 = arith.constant 9 : index
    %c0_30 = arith.constant 0 : index
    %68 = vector.load %arg9[%c9, %c0_30] : memref<26x64xbf16, #tpu.memory_space<vmem>>, vector<16x64xbf16>
    %c10 = arith.constant 10 : index
    %c0_31 = arith.constant 0 : index
    %69 = vector.load %arg9[%c10, %c0_31] : memref<26x64xbf16, #tpu.memory_space<vmem>>, vector<16x64xbf16>
    %c0_i32_32 = arith.constant 0 : i32
    %70 = arith.sitofp %c0_i32_32 : i32 to bf16
    %71 = vector.shape_cast %20 : vector<16x1xi1> to vector<16x1xi1>
    %72 = vector.broadcast %71 : vector<16x1xi1> to vector<16x64xi1>
    %73 = vector.broadcast %70 : bf16 to vector<16x64xbf16>
    %74 = arith.select %72, %69, %73 : vector<16x64xi1>, vector<16x64xbf16>
    %75 = tpu.concatenate %67, %68, %74 in 1 : vector<16x64xbf16>, vector<16x64xbf16>, vector<16x64xbf16> -> vector<16x192xbf16>
    %c384 = arith.constant 384 : index
    %c0_33 = arith.constant 0 : index
    %76 = vector.load %arg2[%c384, %c0_33] : memref<576x64xbf16, #tpu.memory_space<vmem>>, vector<192x64xbf16>
    %cst_34 = arith.constant dense<0.000000e+00> : vector<16x64xf32>
    %77 = tpu.matmul %75, %76, %cst_34 {dimension_numbers = #tpu.dot_dimension_numbers<[1], [0], [0], [1], [0, 0, 1, 1], [], []>} : vector<16x192xbf16>, vector<192x64xbf16>, vector<16x64xf32> -> vector<16x64xf32>
    %78 = arith.addf %61, %77 : vector<16x64xf32>
    %c0_35 = arith.constant 0 : index
    %c0_36 = arith.constant 0 : index
    %79 = vector.load %arg3[%c0_35, %c0_36] : memref<1x64xf32, #tpu.memory_space<vmem>>, vector<1x64xf32>
    %c0_37 = arith.constant 0 : index
    %c0_38 = arith.constant 0 : index
    %80 = vector.load %arg4[%c0_37, %c0_38] : memref<1x64xf32, #tpu.memory_space<vmem>>, vector<1x64xf32>
    %c0_39 = arith.constant 0 : index
    %c0_40 = arith.constant 0 : index
    %81 = vector.load %arg5[%c0_39, %c0_40] : memref<1x64xf32, #tpu.memory_space<vmem>>, vector<1x64xf32>
    %c0_41 = arith.constant 0 : index
    %c0_42 = arith.constant 0 : index
    %82 = vector.load %arg6[%c0_41, %c0_42] : memref<64x8xf32, #tpu.memory_space<vmem>>, vector<64x8xf32>
    %c0_43 = arith.constant 0 : index
    %c0_44 = arith.constant 0 : index
    %83 = vector.load %arg7[%c0_43, %c0_44] : memref<8x64xf32, #tpu.memory_space<vmem>>, vector<8x64xf32>
    %cst_45 = arith.constant dense<0.000000e+00> : vector<64xf32>
    %84 = vector.multi_reduction <add>, %78, %cst_45 [0] : vector<16x64xf32> to vector<64xf32>
    %85 = vector.shape_cast %84 : vector<64xf32> to vector<1x64xf32>
    %86 = arith.mulf %78, %78 : vector<16x64xf32>
    %cst_46 = arith.constant dense<0.000000e+00> : vector<64xf32>
    %87 = vector.multi_reduction <add>, %86, %cst_46 [0] : vector<16x64xf32> to vector<64xf32>
    %88 = vector.shape_cast %87 : vector<64xf32> to vector<1x64xf32>
    %cst_47 = arith.constant 1.600000e+01 : f32
    %89 = vector.broadcast %cst_47 : f32 to vector<1x64xf32>
    %90 = arith.mulf %89, %79 : vector<1x64xf32>
    %91 = arith.addf %85, %90 : vector<1x64xf32>
    %cst_48 = arith.constant 2.000000e+00 : f32
    %92 = vector.broadcast %cst_48 : f32 to vector<1x64xf32>
    %93 = arith.mulf %92, %79 : vector<1x64xf32>
    %94 = arith.mulf %93, %85 : vector<1x64xf32>
    %95 = arith.addf %88, %94 : vector<1x64xf32>
    %cst_49 = arith.constant 1.600000e+01 : f32
    %96 = vector.broadcast %cst_49 : f32 to vector<1x64xf32>
    %97 = arith.mulf %96, %79 : vector<1x64xf32>
    %98 = arith.mulf %97, %79 : vector<1x64xf32>
    %99 = arith.addf %95, %98 : vector<1x64xf32>
    %cst_50 = arith.constant dense<0.000000e+00> : vector<1x8xf32>
    %100 = tpu.matmul %91, %82, %cst_50 {dimension_numbers = #tpu.dot_dimension_numbers<[1], [0], [0], [1], [0, 0, 1, 1], [], []>} : vector<1x64xf32>, vector<64x8xf32>, vector<1x8xf32> -> vector<1x8xf32>
    %cst_51 = arith.constant 7.812500e-03 : f32
    %101 = vector.broadcast %cst_51 : f32 to vector<1x8xf32>
    %102 = arith.mulf %100, %101 : vector<1x8xf32>
    %cst_52 = arith.constant dense<0.000000e+00> : vector<1x8xf32>
    %103 = tpu.matmul %99, %82, %cst_52 {dimension_numbers = #tpu.dot_dimension_numbers<[1], [0], [0], [1], [0, 0, 1, 1], [], []>} : vector<1x64xf32>, vector<64x8xf32>, vector<1x8xf32> -> vector<1x8xf32>
    %cst_53 = arith.constant 7.812500e-03 : f32
    %104 = vector.broadcast %cst_53 : f32 to vector<1x8xf32>
    %105 = arith.mulf %103, %104 : vector<1x8xf32>
    %106 = arith.mulf %102, %102 : vector<1x8xf32>
    %107 = arith.subf %105, %106 : vector<1x8xf32>
    %cst_54 = arith.constant 0.000000e+00 : f32
    %108 = vector.broadcast %cst_54 : f32 to vector<1x8xf32>
    %109 = arith.maximumf %107, %108 : vector<1x8xf32>
    %cst_55 = arith.constant 9.99999974E-6 : f32
    %110 = vector.broadcast %cst_55 : f32 to vector<1x8xf32>
    %111 = arith.addf %109, %110 : vector<1x8xf32>
    %112 = math.rsqrt %111 : vector<1x8xf32>
    %cst_56 = arith.constant dense<0.000000e+00> : vector<1x64xf32>
    %113 = tpu.matmul %102, %83, %cst_56 {dimension_numbers = #tpu.dot_dimension_numbers<[1], [0], [0], [1], [0, 0, 1, 1], [], []>} : vector<1x8xf32>, vector<8x64xf32>, vector<1x64xf32> -> vector<1x64xf32>
    %cst_57 = arith.constant dense<0.000000e+00> : vector<1x64xf32>
    %114 = tpu.matmul %112, %83, %cst_57 {dimension_numbers = #tpu.dot_dimension_numbers<[1], [0], [0], [1], [0, 0, 1, 1], [], []>} : vector<1x8xf32>, vector<8x64xf32>, vector<1x64xf32> -> vector<1x64xf32>
    %115 = arith.mulf %80, %114 : vector<1x64xf32>
    %116 = arith.subf %79, %113 : vector<1x64xf32>
    %117 = arith.mulf %116, %115 : vector<1x64xf32>
    %118 = arith.addf %117, %81 : vector<1x64xf32>
    %119 = vector.broadcast %115 : vector<1x64xf32> to vector<16x64xf32>
    %120 = arith.mulf %78, %119 : vector<16x64xf32>
    %121 = vector.broadcast %118 : vector<1x64xf32> to vector<16x64xf32>
    %122 = arith.addf %120, %121 : vector<16x64xf32>
    %cst_58 = arith.constant 0.000000e+00 : f32
    %123 = vector.broadcast %cst_58 : f32 to vector<16x64xf32>
    %124 = arith.maximumf %122, %123 : vector<16x64xf32>
    %125 = arith.truncf %124 : vector<16x64xf32> to vector<16x64xbf16>
    %c0_59 = arith.constant 0 : index
    %c0_60 = arith.constant 0 : index
    %c0_61 = arith.constant 0 : index
    %126 = vector.load %arg8[%c0_59, %c0_60, %c0_61] : memref<1x16x64xbf16, #tpu.memory_space<vmem>>, vector<1x16x64xbf16>
    %127 = vector.shape_cast %126 : vector<1x16x64xbf16> to vector<16x64xbf16>
    %128 = vector.shape_cast %125 : vector<16x64xbf16> to vector<1x16x64xbf16>
    tpu.vector_store %arg8[%c0_59, %c0_60, %c0_61], %128 {strides = array<i32>} : memref<1x16x64xbf16, #tpu.memory_space<vmem>>, vector<1x16x64xbf16>,
    return
  }
  func.func @transform_0(%arg0: i32) -> (i32, i32, i32) {
    %c0_i32 = arith.constant 0 : i32
    %c0_i32_0 = arith.constant 0 : i32
    %c0_i32_1 = arith.constant 0 : i32
    return %arg0, %c0_i32, %c0_i32_0 : i32, i32, i32
  }
  func.func @transform_1(%arg0: i32) -> (i32, i32) {
    %c0_i32 = arith.constant 0 : i32
    %c0_i32_0 = arith.constant 0 : i32
    %c0_i32_1 = arith.constant 0 : i32
    return %c0_i32, %c0_i32_0 : i32, i32
  }
  func.func @transform_2(%arg0: i32) -> (i32, i32) {
    %c0_i32 = arith.constant 0 : i32
    %c0_i32_0 = arith.constant 0 : i32
    %c0_i32_1 = arith.constant 0 : i32
    return %c0_i32, %c0_i32_0 : i32, i32
  }
  func.func @transform_3(%arg0: i32) -> (i32, i32) {
    %c0_i32 = arith.constant 0 : i32
    %c0_i32_0 = arith.constant 0 : i32
    %c0_i32_1 = arith.constant 0 : i32
    return %c0_i32, %c0_i32_0 : i32, i32
  }
  func.func @transform_4(%arg0: i32) -> (i32, i32) {
    %c0_i32 = arith.constant 0 : i32
    %c0_i32_0 = arith.constant 0 : i32
    %c0_i32_1 = arith.constant 0 : i32
    return %c0_i32, %c0_i32_0 : i32, i32
  }
  func.func @transform_5(%arg0: i32) -> (i32, i32) {
    %c0_i32 = arith.constant 0 : i32
    %c0_i32_0 = arith.constant 0 : i32
    %c0_i32_1 = arith.constant 0 : i32
    return %c0_i32, %c0_i32_0 : i32, i32
  }
  func.func @transform_6(%arg0: i32) -> (i32, i32) {
    %c0_i32 = arith.constant 0 : i32
    %c0_i32_0 = arith.constant 0 : i32
    %c0_i32_1 = arith.constant 0 : i32
    return %c0_i32, %c0_i32_0 : i32, i32
  }
  func.func @transform_7(%arg0: i32) -> (i32, i32, i32) {
    %c0_i32 = arith.constant 0 : i32
    %c0_i32_0 = arith.constant 0 : i32
    %c0_i32_1 = arith.constant 0 : i32
    return %arg0, %c0_i32, %c0_i32_0 : i32, i32, i32
  }
}

</mosaic_0001>

<bundles_post_ra>
// kernel: tpu_custom_call.1
= control target key start
LH: loop header
LB: loop body
LE: loop exit
PB: predicated region body
PF: predicated region fallthrough
CT: control target
= control target key end

     0   :  { %6 = vsyncpa [#allocation3], 0  ;;  %s114_s0 = inlined_call_operand.hbm [shape: f32[8,128], index: 0, kind: input, shape index: {}]   ;;  %s115_s1 = inlined_call_operand.hbm [shape: f32[8,128], index: 1, kind: output, shape index: {}]  }
   0x1   :  { %7 = vsyncpa [#allocation4], 0  ;;  %s13_s8 = sshll.u32 %s114_s0, 4  ;;  %s96_s9 = smov [#allocation2]   ;;  %s14_s8 = int_to_ptr.hbm [resolvable:$true] %s13_s8 }
   0x2   :  { %s15_s10 = sshll.u32 %s96_s9, 4  ;;  %s16_s10 = int_to_ptr.vmem [resolvable:$true] %s15_s10 }
   0x3   :  { %18 = dma.hbm_to_vmem [thread:$0]  %s14_s8, 128, %s16_s10, [#allocation3]  }
   0x4   :  { %92 = dma.done.wait [#allocation3], 128  }
   0x5   :  { %93 = vsyncadd [#allocation3], 4294967168  ;;  %s97_s11 = smov [#allocation5]   ;;  %s32_s15 = sshll.u32 %s115_s1, 4  ;;  %v23_v0 = vld [vmem:[#allocation2] sm:$0xff]  ;;  %s33_s15 = int_to_ptr.hbm [resolvable:$true] %s32_s15 }
   0x6   :  { %s30_s12 = sshll.u32 %s97_s11, 4  ;;  %24 = vst [vmem:[#allocation5] sm:$0xff] %v23_v0  ;;  %s31_s12 = int_to_ptr.vmem [resolvable:$true] %s30_s12 }
   0x7   :  { %35 = dma.vmem_to_hbm [thread:$0]  %s31_s12, 128, %s33_s15, [#allocation4]  }
   0x8   :  { %94 = dma.done.wait [#allocation4], 128  }
   0x9   :  { %95 = vsyncadd [#allocation4], 4294967168 }
   0xa   :  { %40 = vsyncpa [#allocation3], 1 }
   0xb   :  { %41 = vsyncpa [#allocation4], 1 }

// kernel: tpu_custom_call.1
= control target key start
LH: loop header
LB: loop body
LE: loop exit
PB: predicated region body
PF: predicated region fallthrough
CT: control target
= control target key end

     0   :  { %12 = vsyncpa [#allocation4], 0  ;;  %s2162_s0 = inlined_call_operand.vmem [shape: bf16[2,16,64], index: 0, kind: input, shape index: {}]   ;;  %s2163_s1 = inlined_call_operand.vmem [shape: bf16[576,64], index: 1, kind: input, shape index: {}]   ;;  %s2164_s2 = inlined_call_operand.vmem [shape: f32[1,64], index: 2, kind: input, shape index: {}]   ;;  %s2165_s3 = inlined_call_operand.vmem [shape: f32[1,64], index: 3, kind: input, shape index: {}]   ;;  %s2166_s4 = inlined_call_operand.vmem [shape: f32[1,64], index: 4, kind: input, shape index: {}]   ;;  %s2167_s5 = inlined_call_operand.vmem [shape: f32[64,8], index: 5, kind: input, shape index: {}]   ;;  %s2168_s6 = inlined_call_operand.vmem [shape: f32[8,64], index: 6, kind: input, shape index: {}]   ;;  %s2169_s7 = inlined_call_operand.hbm [shape: bf16[2,16,64], index: 7, kind: output, shape index: {}]  }
   0x1   :  { %14 = vsyncpa [#allocation4 + $0x1], 0  ;;  %s1623_s24 = smov 0   ;;  %s1625_s25 = smov 0  }
   0x2   :  { %s1627_s26 = smov 0   ;;  %s1629_s27 = smov 0  }
   0x3 LB: > { %s1644_s28 = sadd.s32 4294967295, %s1578_s27   ;;  %s1266_s29 = sadd.s32 4294967294, %s1578_s27   ;;  %s1578_s27 = sphi %s1629_s27, %s2210_s27   ;;  %s1574_s26 = sphi %s1627_s26, %s2209_s26   ;;  %s1570_s25 = sphi %s1625_s25, %s2208_s25   ;;  %s1566_s24 = sphi %s1623_s24, %s2207_s24  }
   0x4   : > { %s1648_s30 = sadd.s32 1, %s1578_s27   ;;  %s179_s8 = sadd.s32 1, %s1574_s26 }
   0x5   : > { %s176_s9 = ssub.s32 %s1578_s27, %s1648_s30  ;;  %p189_p0 = scmp.ne.s32.totalorder %s1574_s26, %s1570_s25 }
   0x6   : > { %p177_p1 = scmp.eq.s32.totalorder %s176_s9, 0  ;;  %p190_p2 = scmp.eq.s32.totalorder %s1644_s28, 1 }
   0x7   : > { %p195_p3 = scmp.ne.s32.totalorder %s1570_s25, %s1566_s24  ;;  %p196_p4 = scmp.eq.s32.totalorder %s1266_s29, 1 }
   0x8   : > { %s1659_s10 = scalar_select %p177_p1, %s1574_s26, %s179_s8  }
   0x9   : > { %p1661_p5 = por %p190_p2, %p189_p0  ;;  %p1665_p6 = por %p196_p4, %p195_p3 }
   0xa   : > { %p1269_p7 = scmp.ge.s32.totalorder %s1578_s27, 1  ;;  %p240_p8 = scmp.lt.s32.totalorder %s1578_s27, 3 }
   0xc   : > { %p241_p9 = pnand %p1269_p7, %p240_p8 }
   0xd   : > { %p272_p10 = scmp.lt.s32.totalorder (!%p241_p9), %s1644_s28, 1  ;;  %s1581_s9 = smov (!%p241_p9), 64  }
   0xe   : > { %244 = sbr.rel (%p241_p9) target bundleno = 647 (0x287), region = 48  ;;  %s269_s18 = sand.u32 (!%p241_p9), 1, %s1570_s25  }
   0xf   : > { %s1270_s21 = sshll.u32 (!%p241_p9), %s269_s18, 3  ;;  %s1471_s22 = sshll.u32 (!%p241_p9), %s1644_s28, 3 }
  0x10   : > { %s1200_s8 = scalar_lea.hbm (!%p241_p9), %s2169_s7, %s1471_s22 }
  0x11   : > { %s1203_s15 = sshll.u32 (!%p241_p9), %s1200_s8, 4  ;;  %s1204_s15 = int_to_ptr.hbm [resolvable:$true] %s1203_s15 }
  0x12   : > { %s1530_s16 = sshra.s32 (!%p241_p9), %s1204_s15, 4  ;;  %s1531_s16 = int_to_ptr.hbm [resolvable:$true] %s1530_s16 }
  0x13   : > { %v280_v0 = vlaneseq  ;;  %vm311_vm0 = vcmask 518144   ;;  %vm312_vm1 = vsmask.f32 2304  ;;  %vm317_vm2 = vcmask 519170   ;;  %v320_v2 = vld [vmem:[#allocation2 + $0x8] sm:$0xc]  ;;  %p1537_p0 = scmp.lt.s32.totalorder %s1531_s16, %s2169_s7 }
  0x14   : > { %vm1673_vm3 = vmand %vm311_vm0, %vm312_vm1  ;;  %vm318_vm4 = vsmask.f32 7946  ;;  %s273_s13 = scalar_select %p272_p10, %s1644_s28, 1  ;;  %v314_v5 = vld [vmem:[#allocation2] sm:$0x7]  ;;  %vm323_vm6 = vcmask 516096  }
  0x15   : > { %v1678_v3 = vshrl.u32 %v280_v0, 7  ;;  %vm1680_vm5 = vmand %vm317_vm2, %vm318_vm4  ;;  %v315_v7 = vsel %vm1673_vm3, 0, %v314_v5  ;;  %v1580_v16 = vmov 0   ;;  %vm327_vm8 = vsmask.f32 6416  ;;  %v1457_v28 = vld [vmem:[%s2163_s1 + $0xb8] sm:$0xff] }
  0x16   : > { %v321_v6 = vsel %vm1680_vm5, 0, %v320_v2  ;;  %s1433_s14 = sshll.u32 %s273_s13, 3  ;;  %316 = vst [vmem:[#allocation2] sm:$0x7] %v315_v7  ;;  %vm1702_vm10 = vmor %vm312_vm1, %vm327_vm8  ;;  %v1441_v34 = vld [vmem:[%s2163_s1 + $0x38] sm:$0xff]  ;;  %vm2170_vm11 = vcmask 519168   ;;  %727 = vmatpush.bf16.msra.mxu1 %v1457_v28  ;;  %v1747_v47 = vunpack.c.l.b16 %v1580_v16  ;;  %v1750_v48 = vunpack.c.h.b16 %v1580_v16 }
  0x17   : > { %v1689_v8 = vadd.s32 8, %v1678_v3  ;;  %322 = vst [vmem:[#allocation2 + $0x8] sm:$0xc] %v321_v6  ;;  %s276_s17 = scalar_lea.vmem %s2162_s0, %s1433_s14  ;;  %v287_v29 = vand.u32 3, %v1678_v3  ;;  %v1445_v35 = vld [vmem:[%s2163_s1 + $0x58] sm:$0xff]  ;;  %v1456_v37 = vld [vmem:[%s2163_s1 + $0xb0] sm:$0xff]  ;;  %812 = vmatpush.bf16.msra.mxu2 %v1441_v34 }
  0x18   : > { %v326_v10 = vld [vmem:[%s276_s17 + $0x4] sm:$0xf]  ;;  %v325_v11 = vld [vmem:[%s276_s17] sm:$0xf]  ;;  %324 = vst.msk [vmem:[#allocation2 + $0xc] sm:$0x1] %vm323_vm6, %v1580_v16  ;;  %830 = vmatpush.bf16.msra.mxu3 %v1445_v35 }
  0x19   : > { %v294_v9 = vand.u32 3, %v1689_v8  ;;  %v339_v12 = vshrl.u32 %v326_v10, 16  ;;  %v342_v13 = vshll.u32 %v326_v10, 16  ;;  %v330_v14 = vshrl.u32 %v325_v11, 16  ;;  %v1440_v42 = vld [vmem:[%s2163_s1 + $0x30] sm:$0xff]  ;;  %v1453_v45 = vld [vmem:[%s2163_s1 + $0x98] sm:$0xff] }
  0x1a   : > { %v333_v15 = vshll.u32 %v325_v11, 16  ;;  %v1444_v43 = vld [vmem:[%s2163_s1 + $0x50] sm:$0xff]  ;;  %vm1742_vm12 = vcmp.lt.s32.totalorder %v287_v29, 3  ;;  %728 = vmatpush.bf16.msra.mxu1 %v1456_v37  ;;  %v1455_v50 = vld [vmem:[%s2163_s1 + $0xa8] sm:$0xff]  ;;  %709 = vmatpush.bf16.msra.mxu0 %v1453_v45  ;;  %v1454_v58 = vld [vmem:[%s2163_s1 + $0xa0] sm:$0xff]  ;;  %vm379_vm1 = vcmask 1040384  }
  0x1b   : > { %vm310_vm7 = vcmp.lt.s32.totalorder %v294_v9, 3  ;;  %v341_v17 = vrot.slane %v339_v12, 5  ;;  %v344_v18 = vrot.slane %v342_v13, 6  ;;  %v332_v19 = vrot.slane %v330_v14, 5  ;;  %v1452_v51 = vld [vmem:[%s2163_s1 + $0x90] sm:$0xff]  ;;  %813 = vmatpush.bf16.msra.mxu2 %v1440_v42  ;;  %v1439_v55 = vld [vmem:[%s2163_s1 + $0x28] sm:$0xff]  ;;  %vm375_vm15 = vmpackc.low %vm1742_vm12, %vm1742_vm12 }
  0x1c   : > { %vm376_vm9 = vmpackc.low %vm310_vm7, %vm310_vm7  ;;  %v335_v20 = vrot.slane %v333_v15, 6  ;;  %831 = vmatpush.bf16.msra.mxu3 %v1444_v43  ;;  %v1443_v56 = vld [vmem:[%s2163_s1 + $0x48] sm:$0xff]  ;;  %v377_v59 = vsel %vm375_vm15, 65537, %v1580_v16  ;;  %v1466_v63 = vld [vmem:[%s2163_s1 + $0xf8] sm:$0xff]  ;;  %vm380_vm2 = vcmask 1044484   ;;  %vm519_vm4 = vcmask 1046532  }
  0x1d   : > { %v1699_v21 = vsel %vm376_vm9, 65537, %v1580_v16  ;;  %v345_v23 = vor.u32 %v344_v18, %v341_v17  ;;  %v351_v27 = vld [vmem:[#allocation2] sm:$0xc]  ;;  %v1801_v1 = vrot.slane %v377_v59, 7  ;;  %v1451_v2 = vld [vmem:[%s2163_s1 + $0x88] sm:$0xff]  ;;  %v1828_v22 = vrot.slane %v377_v59, 5  ;;  %vm1850_vm6 = vmor %vm379_vm1, %vm380_vm2 }
  0x1e   : > { %v523_v24 = vrot.slane %v1699_v21, 5  ;;  %v336_v25 = vor.u32 %v335_v20, %v332_v19  ;;  %v356_v26 = vld [vmem:[#allocation2 + $0x8] sm:$0x7]  ;;  %v384_v52 = vrot.slane %v1699_v21, 7  ;;  %729 = vmatpush.bf16.msra.mxu1 %v1455_v50  ;;  %v1438_v0 = vld [vmem:[%s2163_s1 + $0x20] sm:$0xff]  ;;  %710 = vmatpush.bf16.msra.mxu0 %v1452_v51  ;;  %v1437_v34 = vld [vmem:[%s2163_s1 + $0x18] sm:$0xff] }
  0x1f   : > { %v347_v30 = vrot.slane %v345_v23, 4  ;;  %v1721_v36 = vld [vmem:[#allocation2 + $0xc] sm:$0x1]  ;;  %814 = vmatpush.bf16.msra.mxu2 %v1439_v55  ;;  %v1442_v15 = vld [vmem:[%s2163_s1 + $0x40] sm:$0xff]  ;;  %v383_v28 = vrot.slane %v1801_v1, 4  ;;  %v387_v35 = vunpack.c.l.b16 %v1801_v1  ;;  %v388_v37 = vunpack.c.h.b16 %v1801_v1  ;;  %s271_s13 = scalar_lea.vmem [#allocation3], %s1270_s21 }
  0x20   : > { %v525_v31 = vrot.slane %v523_v24, 4  ;;  %v337_v32 = vrot.slane %v336_v25, 4  ;;  %v352_v33 = vsel %vm1680_vm5, %v336_v25, %v351_v27  ;;  %v859_v44 = vunpack.c.l.b16 %v1721_v36  ;;  %832 = vmatpush.bf16.msra.mxu3 %v1443_v56  ;;  %v1464_v55 = vld [vmem:[%s2163_s1 + $0xe8] sm:$0xff]  ;;  %v1449_v56 = vld [vmem:[%s2163_s1 + $0x78] sm:$0xff]  ;;  %v1459_v3 = vld [vmem:[%s2163_s1 + $0xc0] sm:$0xff]  ;;  %s1201_s14 = sshll.u32 %s271_s13, 4  ;;  %s1202_s14 = int_to_ptr.vmem [resolvable:$true] %s1201_s14 }
  0x21   : > { %353 = vst [vmem:[#allocation2] sm:$0xc] %v352_v33  ;;  %v357_v38 = vsel %vm1673_vm3, %v347_v30, %v356_v26  ;;  %v1785_v60 = vrot.slane %v384_v52, 4  ;;  %vm518_vm3 = vcmask 1042432   ;;  %vm424_vm5 = vsmask.f32 7424 }
  0x22   : > { %v540_v39 = vunpack.c.l.b16 %v525_v31  ;;  %v541_v40 = vunpack.c.h.b16 %v525_v31  ;;  %v346_v41 = vsel %vm1702_vm10, %v337_v32, %v345_v23  ;;  %358 = vst [vmem:[#allocation2 + $0x8] sm:$0x7] %v357_v38  ;;  %v861_v49 = vpack.c.b16 %v859_v44, %v859_v44  ;;  %v1470_v23 = vld [vmem:[%s2163_s1 + $0x118] sm:$0xff]  ;;  %730 = vmatpush.bf16.msra.mxu1 %v1454_v58  ;;  %711 = vmatpush.bf16.msra.mxu0 %v1451_v2  ;;  %v1450_v30 = vld [vmem:[%s2163_s1 + $0x80] sm:$0xff]  ;;  %v1465_v33 = vld [vmem:[%s2163_s1 + $0xf0] sm:$0xff]  ;;  %s1189_s28 = scalar_lea.sflag [#allocation4], %s269_s18 }
  0x23   : > { %355 = vst.msk [vmem:[#allocation2 + $0x4] sm:$0xf] %vm2170_vm11, %v346_v41  ;;  %v401_v17 = vunpack.c.l.b16 %v1785_v60  ;;  %v402_v20 = vunpack.c.h.b16 %v1785_v60  ;;  %815 = vmatpush.bf16.msra.mxu2 %v1438_v0  ;;  %v522_v46 = vrot.slane %v1828_v22, 4  ;;  %v385_v59 = vsel %vm1850_vm6, %v383_v28, %v384_v52  ;;  %vm1884_vm9 = vmor %vm518_vm3, %vm519_vm4  ;;  %v1436_v52 = vld [vmem:[%s2163_s1 + $0x10] sm:$0xff]  ;;  %v1467_v60 = vld [vmem:[%s2163_s1 + $0x100] sm:$0xff]  ;;  %s1532_s17 = scalar_lea.hbm %s1531_s16, 8 }
  0x24   : > { %vm1761_vm13 = vcmp.ne.s32.totalorder %v540_v39, %v1747_v47  ;;  %vm1766_vm14 = vcmp.ne.s32.totalorder %v541_v40, %v1750_v48  ;;  %v870_v57 = vshll.u32 %v861_v49, 16  ;;  %833 = vmatpush.bf16.msra.mxu3 %v1442_v15  ;;  %v1469_v49 = vld [vmem:[%s2163_s1 + $0x110] sm:$0xff]  ;;  %vm1873_vm7 = vcmp.ne.s32.totalorder %v387_v35, %v1747_v47  ;;  %v1468_v15 = vld [vmem:[%s2163_s1 + $0x108] sm:$0xff]  ;;  %p1533_p11 = scmp.ne.s32.totalorder %s1531_s16, %s1532_s17  ;;  %s1536_s21 = scalar_lea.hbm %s2169_s7, 16 }
  0x25   : > { %vm546_vm0 = vmpackc.low %vm1766_vm14, %vm1761_vm13  ;;  %vm1878_vm8 = vcmp.ne.s32.totalorder %v388_v37, %v1750_v48  ;;  %vm1898_vm12 = vcmp.ne.s32.totalorder %v401_v17, %v1747_v47  ;;  %vm1903_vm13 = vcmp.ne.s32.totalorder %v402_v20, %v1750_v48  ;;  %v524_v20 = vsel %vm1884_vm9, %v522_v46, %v523_v24  ;;  %v1463_v24 = vld [vmem:[%s2163_s1 + $0xe0] sm:$0xff]  ;;  %v1447_v8 = vld [vmem:[%s2163_s1 + $0x68] sm:$0xff]  ;;  %p1538_p1 = scmp.lt.s32.totalorder %s1536_s21, %s1532_s17 }
  0x26   : > { %v1815_v14 = vrot.slane %v870_v57, 1  ;;  %990 = vmatpush.bf16.msrb.mxu1 %v1466_v63  ;;  %712 = vmatpush.bf16.msra.mxu0 %v1450_v30  ;;  %vm393_vm10 = vmpackc.low %vm1878_vm8, %vm1873_vm7  ;;  %v533_v35 = vunpack.c.l.b16 %v524_v20  ;;  %v534_v37 = vunpack.c.h.b16 %v524_v20  ;;  %vm307_vm7 = vcmp.ge.s32.totalorder %v287_v29, 1  ;;  %p1534_p12 = pnand %p1533_p11, %p1661_p5 }
  0x27   : > { %816 = vmatpush.bf16.msra.mxu2 %v1437_v34  ;;  %vm407_vm15 = vmpackc.low %vm1903_vm13, %vm1898_vm12  ;;  %vm484_vm12 = vcmask 1041408   ;;  %vm485_vm13 = vcmask 1045508   ;;  %p1539_p2 = por %p1538_p1, %p1537_p0 }
  0x28   : > { %v1787_v61 = vld [vmem:[#allocation2] sm:$0xf]  ;;  %1008 = vmatpush.bf16.msrb.mxu3 %v1470_v23  ;;  %vm537_vm6 = vcmp.ne.s32.totalorder %v533_v35, %v1747_v47  ;;  %vm538_vm9 = vcmp.ne.s32.totalorder %v534_v37, %v1750_v48  ;;  %p1535_p13 = pneg %p1534_p12 }
  0x29   : > { %v1789_v62 = vld [vmem:[#allocation2] sm:$0xc]  ;;  %v516_v4 = vld [vmem:[#allocation2 + $0x8] sm:$0x7]  ;;  %v419_v6 = vunpack.c.l.b16 %v1787_v61  ;;  %vm539_vm11 = vmpackc.low %vm538_vm9, %vm537_vm6 }
  0x2a   : > { %v1806_v5 = vld [vmem:[#allocation2 + $0x8] sm:$0x1]  ;;  %v560_v7 = vunpack.c.l.b16 %v1789_v62  ;;  %v561_v10 = vunpack.c.l.b16 %v516_v4  ;;  %v1810_v11 = vld [vmem:[#allocation2 + $0x4] sm:$0xf]  ;;  %v549_v18 = vsel %vm546_vm0, %v516_v4, 0  ;;  %991 = vmatpush.bf16.msrb.mxu1 %v1465_v33  ;;  %713 = vmatpush.bf16.msra.mxu0 %v1449_v56  ;;  %p1540_p3 = pnand %p1539_p2, %p1535_p13 }
  0x2b   : > { %v421_v12 = vunpack.c.l.b16 %v1806_v5  ;;  %v1813_v13 = vld [vmem:[#allocation2 + $0x4] sm:$0xff]  ;;  %v420_v19 = vunpack.c.l.b16 %v1810_v11  ;;  %v588_v40 = vunpack.c.l.b16 %v549_v18  ;;  %v370_v58 = vld [vmem:[#allocation2] sm:$0xe]  ;;  %v410_v21 = vsel %vm407_vm15, %v1806_v5, 0  ;;  %817 = vmatpush.bf16.msra.mxu2 %v1436_v52 }
  0x2c   : > { %v563_v25 = vpack.c.b16 %v561_v10, %v561_v10  ;;  %v865_v27 = vshll.u32 %v1813_v13, 16  ;;  %v863_v45 = vshrl.u32 %v1813_v13, 16  ;;  %v395_v10 = vunpack.c.h.b16 %v385_v59  ;;  %1009 = vmatpush.bf16.msrb.mxu3 %v1469_v49  ;;  %v517_v34 = vld [vmem:[#allocation2] sm:$0x8]  ;;  %v1988_v52 = vld [vmem:[#allocation2 + $0x8] sm:$0xf] }
  0x2d   : > { %v423_v26 = vpack.c.b16 %v421_v12, %v421_v12  ;;  %v422_v31 = vpack.c.b16 %v420_v19, %v419_v6  ;;  %v1838_v32 = vpack.c.b16 %v420_v19, %v560_v7  ;;  %v394_v6 = vunpack.c.l.b16 %v385_v59  ;;  %v1448_v13 = vld [vmem:[%s2163_s1 + $0x70] sm:$0xff]  ;;  %v481_v37 = vld [vmem:[#allocation2 + $0x8] sm:$0x3] }
  0x2e   : > { %v572_v38 = vshll.u32 %v563_v25, 16  ;;  %v576_v39 = vshrl.u32 %v563_v25, 16  ;;  %v867_v53 = vrot.slane %v865_v27, 1  ;;  %v1911_v18 = vpack.c.b16 %v588_v40, %v588_v40  ;;  %992 = vmatpush.bf16.msrb.mxu1 %v1464_v55  ;;  %v1435_v27 = vld [vmem:[%s2163_s1 + $0x8] sm:$0xff]  ;;  %v1462_v40 = vld [vmem:[%s2163_s1 + $0xd8] sm:$0xff]  ;;  %714 = vmatpush.bf16.msra.mxu0 %v1448_v13  ;;  %v1023_v13 = vld [vmem:[%s2167_s5] sm:$0xff] }
  0x2f   : > { %v433_v41 = vshll.u32 %v423_v26, 16  ;;  %v426_v43 = vshrl.u32 %v422_v31, 16  ;;  %v428_v44 = vshll.u32 %v422_v31, 16  ;;  %v567_v54 = vshll.u32 %v1838_v32, 16  ;;  %818 = vmatpush.bf16.msra.mxu2 %v1435_v27  ;;  %v1446_v26 = vld [vmem:[%s2163_s1 + $0x60] sm:$0xff] }
  0x30   : > { %v1859_v50 = vrot.slane %v572_v38, 1  ;;  %v565_v2 = vshrl.u32 %v1838_v32, 16  ;;  %vm1914_vm14 = vcmp.ne.s32.totalorder %v394_v6, %v1747_v47  ;;  %v408_v19 = vsel %vm393_vm10, %v370_v58, 0  ;;  %1010 = vmatpush.bf16.msrb.mxu3 %v1468_v15 }
  0x31   : > { %v435_v51 = vrot.slane %v433_v41, 1  ;;  %v430_v57 = vrot.slane %v428_v44, 1  ;;  %v569_v4 = vrot.slane %v567_v54, 1  ;;  %v868_v25 = vor.u32 %v867_v53, %v863_v45  ;;  %v1434_v41 = vld [vmem:[%s2163_s1] sm:$0xff]  ;;  %v1461_v54 = vld [vmem:[%s2163_s1 + $0xd0] sm:$0xff] }
  0x32   : > { %v578_v1 = vor.u32 %v576_v39, %v1859_v50  ;;  %vm1933_vm0 = vcmp.ne.s32.totalorder %v395_v10, %v1750_v48  ;;  %v442_v28 = vunpack.c.l.b16 %v408_v19  ;;  %v444_v30 = vunpack.c.l.b16 %v410_v21  ;;  %993 = vmatpush.bf16.msrb.mxu1 %v1463_v24  ;;  %715 = vmatpush.bf16.msra.mxu0 %v1447_v8 }
  0x33   : > { %v431_v7 = vor.u32 %v430_v57, %v426_v43  ;;  %vm400_vm1 = vmpackc.low %vm1933_vm0, %vm1914_vm14  ;;  %v526_v5 = vunpack.c.l.b16 %v1828_v22  ;;  %v527_v31 = vunpack.c.h.b16 %v1828_v22  ;;  %v570_v32 = vor.u32 %v569_v4, %v565_v2  ;;  %819 = vmatpush.bf16.msra.mxu2 %v1434_v41 }
  0x34   : > { %581 = vrot.lane.b32.xlu1 %v578_v1, %s1581_s9  ;;  %v409_v33 = vsel %vm400_vm1, %v1810_v11, 0  ;;  %v446_v39 = vpack.c.b16 %v444_v30, %v444_v30  ;;  %v873_v22 = vsel %vm424_vm5, %v868_v25, %v1815_v14  ;;  %v548_v45 = vsel %vm539_vm11, %v1810_v11, 0  ;;  %v845_v1 = vld [vmem:[#allocation2 + $0x4] sm:$0xe]  ;;  %1011 = vmatpush.bf16.msrb.mxu3 %v1467_v60  ;;  %vm486_vm14 = vmor %vm484_vm12, %vm485_vm13  ;;  %v1026_v60 = vld [vmem:[%s2167_s5 + $0x18] sm:$0xff] }
  0x35   : > { %v436_v23 = vsel %vm424_vm5, %v431_v7, %v435_v51  ;;  %v443_v38 = vunpack.c.l.b16 %v409_v33  ;;  %vm530_vm2 = vcmp.ne.s32.totalorder %v526_v5, %v1747_v47  ;;  %vm531_vm3 = vcmp.ne.s32.totalorder %v527_v31, %v1750_v48 }
  0x36   : > { %437 = vrot.lane.b32.xlu0 %v436_v23, %s1581_s9  ;;  %vm532_vm4 = vmpackc.low %vm531_vm3, %vm530_vm2  ;;  %v449_v43 = vrot.slane %v446_v39, 1  ;;  %v575_v14 = vsel %vm424_vm5, %v570_v32, %v1859_v50  ;;  %vm447_vm2 = vcmask 1046528   ;;  %vm451_vm3 = vcmask 523264   ;;  %994 = vmatpush.bf16.msrb.mxu1 %v1462_v40 }
  0x37   : > { %v445_v42 = vpack.c.b16 %v443_v38, %v442_v28  ;;  %v547_v44 = vsel %vm532_vm4, %v517_v34, 0  ;;  %v587_v51 = vunpack.c.l.b16 %v548_v45  ;;  %v592_v53 = vrot.slane %v1911_v18, 1  ;;  %716 = vmatpush.bf16.msra.mxu0 %v1446_v26 }
  0x38   : > { %v586_v46 = vunpack.c.l.b16 %v547_v44  ;;  %vm626_vm11 = vcmask 1045504   ;;  %v846_v2 = vsel %vm393_vm10, %v845_v1, 0  ;;  %v847_v4 = vsel %vm400_vm1, %v1988_v52, 0  ;;  %vm2030_vm10 = vmpackc.low %vm307_vm7, %vm307_vm7 }
  0x39   : > { %v448_v49 = vrot.slane %v445_v42, 1  ;;  %v631_v57 = vrot.slane %v592_v53, 2  ;;  %v848_v6 = vsel %vm407_vm15, %v1721_v36, 0  ;;  %v879_v7 = vunpack.c.l.b16 %v846_v2  ;;  %v1460_v36 = vld [vmem:[%s2163_s1 + $0xc8] sm:$0xff]  ;;  %v1030_v2 = vld [vmem:[%s2167_s5 + $0x38] sm:$0xff] }
  0x3a   : > { %v589_v55 = vpack.c.b16 %v587_v51, %v586_v46  ;;  %995 = vmatpush.bf16.msrb.mxu1 %v1461_v54  ;;  %v880_v63 = vunpack.c.l.b16 %v847_v4  ;;  %v881_v10 = vunpack.c.l.b16 %v848_v6  ;;  %vm308_vm5 = vcmp.ge.s32.totalorder %v294_v9, 1  ;;  %1094 = vmatpush.msrb.mxu2 %v1030_v2  ;;  %v1029_v4 = vld [vmem:[%s2167_s5 + $0x30] sm:$0xff] }
  0x3b   : > { %v450_v50 = vsel %vm447_vm2, %v448_v49, %v449_v43  ;;  %vm2020_vm8 = vmpackc.low %vm308_vm5, %vm308_vm5  ;;  %v482_v23 = vsel %vm2030_vm10, 65537, %v1580_v16  ;;  %v367_v34 = vsel %vm2030_vm10, %v1787_v61, 0  ;;  %v841_v61 = vsel %vm2030_vm10, %v1810_v11, 0  ;;  %1070 = vmatpush.msrb.mxu0 %v1030_v2 }
  0x3c   : > { %874 = vrot.lane.b32.xlu1 %v873_v22, %s1581_s9  ;;  %1370 = vmatmul.msk.bf16.vlgmr.msra.gmra.mxu3 %vm451_vm3, %v450_v50  ;;  %v591_v56 = vrot.slane %v589_v55, 1  ;;  %v882_v15 = vpack.c.b16 %v880_v63, %v879_v7  ;;  %v883_v18 = vpack.c.b16 %v881_v10, %v881_v10  ;;  %v483_v20 = vsel %vm2020_vm8, 65537, %v1580_v16  ;;  %v1028_v63 = vld [vmem:[%s2167_s5 + $0x28] sm:$0xff]  ;;  %v1027_v10 = vld [vmem:[%s2167_s5 + $0x20] sm:$0xff] }
  0x3d   : > { %v489_v25 = vrot.slane %v483_v20, 6  ;;  %v487_v21 = vrot.slane %v482_v23, 6  ;;  %v368_v35 = vsel %vm2020_vm8, %v1810_v11, 0  ;;  %v413_v38 = vunpack.c.l.b16 %v367_v34  ;;  %1071 = vmatpush.msrb.mxu0 %v1029_v4  ;;  %1095 = vmatpush.msrb.mxu2 %v1029_v4 }
  0x3e   : > { %579 = vrot.lane.b32.xlu0 %v575_v14, %s1581_s9  ;;  %v593_v58 = vsel %vm447_vm2, %v591_v56, %v592_v53  ;;  %v884_v12 = vrot.slane %v882_v15, 1  ;;  %v885_v17 = vrot.slane %v883_v18, 1  ;;  %996 = vmatpush.bf16.msrb.mxu1 %v1460_v36  ;;  %v414_v39 = vunpack.c.l.b16 %v368_v35  ;;  %v1025_v15 = vld [vmem:[%s2167_s5 + $0x10] sm:$0xff]  ;;  %v1024_v18 = vld [vmem:[%s2167_s5 + $0x8] sm:$0xff] }
  0x3f   : > { %v630_v59 = vrot.slane %v593_v58, 2  ;;  %v491_v24 = vrot.slane %v489_v25, 4  ;;  %v488_v27 = vrot.slane %v487_v21, 4  ;;  %v492_v31 = vunpack.c.l.b16 %v487_v21  ;;  %1072 = vmatpush.msrb.mxu0 %v1028_v63  ;;  %1096 = vmatpush.msrb.mxu2 %v1028_v63 }
  0x40   : > { %v886_v29 = vsel %vm447_vm2, %v884_v12, %v885_v17  ;;  %v493_v32 = vunpack.c.h.b16 %v487_v21  ;;  %v842_v40 = vsel %vm2020_vm8, %v1988_v52, 0  ;;  %v415_v42 = vpack.c.b16 %v414_v39, %v413_v38 }
  0x41   : > { %v632_v0 = vsel %vm626_vm11, %v630_v59, %v631_v57  ;;  %v506_v28 = vunpack.c.l.b16 %v491_v24  ;;  %v507_v30 = vunpack.c.h.b16 %v491_v24  ;;  %v490_v5 = vsel %vm486_vm14, %v488_v27, %v489_v25  ;;  %1073 = vmatpush.msrb.mxu0 %v1027_v10  ;;  %1097 = vmatpush.msrb.mxu2 %v1027_v10 }
  0x42   : > { %1321 = vmatmul.msk.bf16.vlgmr.msra.gmra.mxu1 %vm451_vm3, %v632_v0  ;;  %v499_v16 = vunpack.c.l.b16 %v490_v5  ;;  %v500_v33 = vunpack.c.h.b16 %v490_v5  ;;  %vm496_vm4 = vcmp.ne.s32.totalorder %v492_v31, %v1747_v47  ;;  %vm497_vm6 = vcmp.ne.s32.totalorder %v493_v32, %v1750_v48 }
  0x43   : > { %997 = vmatpush.bf16.msrb.mxu1 %v1459_v3  ;;  %vm510_vm15 = vcmp.ne.s32.totalorder %v506_v28, %v1747_v47  ;;  %vm511_vm0 = vcmp.ne.s32.totalorder %v507_v30, %v1750_v48  ;;  %vm498_vm5 = vmpackc.low %vm497_vm6, %vm496_vm4  ;;  %v851_v44 = vunpack.c.l.b16 %v841_v61  ;;  %v852_v14 = vunpack.c.l.b16 %v842_v40  ;;  %1074 = vmatpush.msrb.mxu0 %v1026_v60 }
  0x44   : > { %vm512_vm1 = vmpackc.low %vm511_vm0, %vm510_vm15  ;;  %vm503_vm9 = vcmp.ne.s32.totalorder %v499_v16, %v1747_v47  ;;  %vm504_vm2 = vcmp.ne.s32.totalorder %v500_v33, %v1750_v48  ;;  %v513_v47 = vsel %vm498_vm5, %v1789_v62, 0  ;;  %1098 = vmatpush.msrb.mxu2 %v1026_v60  ;;  %vm2205_vm12 = vcmask 519168  }
  0x45   : > { %v515_v22 = vsel %vm512_vm1, %v481_v37, 0  ;;  %vm505_vm7 = vmpackc.low %vm504_vm2, %vm503_vm9  ;;  %v553_v51 = vunpack.c.l.b16 %v513_v47  ;;  %v853_v54 = vpack.c.b16 %v852_v14, %v851_v44  ;;  %1075 = vmatpush.msrb.mxu0 %v1025_v15 }
  0x46   : > { %v555_v41 = vunpack.c.l.b16 %v515_v22  ;;  %v514_v48 = vsel %vm505_vm7, %v1810_v11, 0  ;;  %1099 = vmatpush.msrb.mxu2 %v1025_v15  ;;  %vm2206_vm13 = vmmov %vm2205_vm12 }
  0x47   : > { %v554_v53 = vunpack.c.l.b16 %v514_v48  ;;  %1076 = vmatpush.msrb.mxu0 %v1024_v18 }
  0x48   : > { %v557_v46 = vpack.c.b16 %v555_v41, %v555_v41  ;;  %1100 = vmatpush.msrb.mxu2 %v1024_v18 }
  0x49   : > { %v556_v55 = vpack.c.b16 %v554_v53, %v553_v51  ;;  %1077 = vmatpush.msrb.mxu0 %v1023_v13 }
  0x4a   : > { %1101 = vmatpush.msrb.mxu2 %v1023_v13  ;;  %v1021_v13 = vld [vmem:[%s2165_s3] sm:$0x1] }
  0x4c   : > { %1423 = vmatmul.msk.bf16.vlgmr.msrb.gmra.mxu3 %vm451_vm3, %v886_v29 }
  0xa6   : > { %v582_v43 = vpop.permute.xlu1 %581 }
  0xa7   : > { %v599_v50 = vsel %vm451_vm3, %v557_v46, %v582_v43 }
  0xa8   : > { %v438_v45 = vpop.permute.xlu0 %437  ;;  %v628_v58 = vrot.slane %v599_v50, 2 }
  0xa9   : > { %v454_v49 = vsel %vm451_vm3, %v415_v42, %v438_v45  ;;  %v1020_v42 = vld [vmem:[%s2164_s2] sm:$0x1] }
  0xaa   : > { %820 = vmatmul.bf16.vlgmr.msra.gmra.mxu2 %v454_v49  ;;  %v1052_v44 = vmul.f32 16.0, %v1020_v42  ;;  %v1054_v45 = vmul.f32 2.0, %v1020_v42 }
  0xac   : > { %v1057_v50 = vmul.f32 %v1052_v44, %v1020_v42 }
  0xae   : > { %v875_v56 = vpop.permute.xlu1 %874 }
  0xaf   : > { %v889_v57 = vsel %vm451_vm3, %v853_v54, %v875_v56 }
  0xb0   : > { %v580_v62 = vpop.permute.xlu0 %579  ;;  %998 = vmatmul.bf16.vlgmr.msrb.gmra.mxu1 %v889_v57  ;;  %v1031_v57 = vld [vmem:[%s2168_s6] sm:$0xff] }
  0xb1   : > { %v596_v11 = vsel %vm451_vm3, %v556_v55, %v580_v62  ;;  %1140 = vmatpush.msra.mxu3 %v1031_v57 }
  0xb2   : > { %v627_v59 = vrot.slane %v596_v11, 2 }
  0xb4   : > { %v629_v0 = vsel %vm626_vm11, %v627_v59, %v628_v58  ;;  %vm1121_vm11 = vcmask 64512  }
  0xb5   : > { %717 = vmatmul.bf16.vlgmr.msra.gmra.mxu0 %v629_v0 }
  0xb6   : > { %1163 = vmatpush.msra.mxu0 %v1031_v57 }
  0xbf   : > { %v835_v52 = vpop.f32.mrf.mxu3  ;;  %v732_v1 = vpop.f32.mrf.mxu1 }
  0xc7   : > { %v837_v6 = vpop.f32.mrf.mxu3  ;;  %v734_v7 = vpop.f32.mrf.mxu1 }
  0xcf   : > { %v1013_v12 = vpop.f32.mrf.mxu3 }
  0xd7   : > { %v1015_v23 = vpop.f32.mrf.mxu3 }
 0x12d   : > { %v821_v36 = vpop.f32.mrf.mxu2  ;;  %v999_v17 = vpop.f32.mrf.mxu1 }
 0x12e   : > { %v1014_v9 = vadd.f32 %v1013_v12, %v999_v17 }
 0x132   : > { %v718_v19 = vpop.f32.mrf.mxu0 }
 0x133   : > { %v733_v8 = vadd.f32 %v732_v1, %v718_v19  ;;  %v1022_v19 = vld [vmem:[%s2166_s4] sm:$0x1] }
 0x135   : > { %v822_v3 = vadd.f32 %v821_v36, %v733_v8  ;;  %v823_v26 = vpop.f32.mrf.mxu2  ;;  %v1001_v21 = vpop.f32.mrf.mxu1 }
 0x136   : > { %v1016_v28 = vadd.f32 %v1015_v23, %v1001_v21 }
 0x137   : > { %v836_v29 = vadd.f32 %v835_v52, %v822_v3 }
 0x139   : > { %v2094_v24 = vadd.f32 %v1014_v9, %v836_v29 }
 0x13a   : > { %v720_v20 = vpop.f32.mrf.mxu0 }
 0x13b   : > { %v735_v25 = vadd.f32 %v734_v7, %v720_v20  ;;  %v1041_v5 = vmul.f32 %v2094_v24, %v2094_v24  ;;  %v1032_v32 = vsel %vm451_vm3, %v2094_v24, 0.0 }
 0x13d   : > { %v824_v27 = vadd.f32 %v823_v26, %v735_v25  ;;  %v1043_v35 = vsel %vm451_vm3, %v1041_v5, 0.0 }
 0x13f   : > { %v838_v30 = vadd.f32 %v837_v6, %v824_v27 }
 0x141   : > { %v2098_v31 = vadd.f32 %v1016_v28, %v838_v30 }
 0x143   : > { %v1033_v16 = vsel %vm451_vm3, %v2098_v31, 0.0  ;;  %v1042_v33 = vmul.f32 %v2098_v31, %v2098_v31 }
 0x144   : > { %v1034_v34 = vadd.f32 %v1033_v16, %v1032_v32 }
 0x145   : > { %v1044_v37 = vsel %vm451_vm3, %v1042_v33, 0.0 }
 0x146   : > { %v1035_v38 = vrot.slane %v1034_v34, 4  ;;  %v1045_v39 = vadd.f32 %v1044_v37, %v1043_v35 }
 0x148   : > { %v1046_v22 = vrot.slane %v1045_v39, 4  ;;  %v1036_v61 = vadd.f32 %v1035_v38, %v1034_v34 }
 0x14a   : > { %v1037_v40 = vrot.slane %v1036_v61, 2  ;;  %v1047_v41 = vadd.f32 %v1046_v22, %v1045_v39 }
 0x14c   : > { %v1038_v43 = vadd.f32 %v1037_v40, %v1036_v61  ;;  %v1048_v47 = vrot.slane %v1047_v41, 2 }
 0x14e   : > { %v1039_v48 = vrot.slane %v1038_v43, 1  ;;  %v1049_v14 = vadd.f32 %v1048_v47, %v1047_v41 }
 0x150   : > { %v1040_v46 = vadd.f32 %v1039_v48, %v1038_v43  ;;  %v1050_v49 = vrot.slane %v1049_v14, 1 }
 0x152   : > { %v1053_v51 = vadd.f32 %v1052_v44, %v1040_v46  ;;  %v1051_v53 = vadd.f32 %v1050_v49, %v1049_v14  ;;  %v1055_v54 = vmul.f32 %v1054_v45, %v1040_v46 }
 0x154   : > { %1424 = vmatmul.msk.f32.vlgmr.msrb.gmra.mxu0 %vm451_vm3, %v1053_v51  ;;  %v1056_v55 = vadd.f32 %v1055_v54, %v1051_v53 }
 0x156   : > { %v1058_v56 = vadd.f32 %v1057_v50, %v1056_v55 }
 0x158   : > { %1425 = vmatmul.msk.f32.vlgmr.msrb.gmra.mxu2 %vm451_vm3, %v1058_v56 }
 0x1d1   : > { %v1079_v58 = vpop.f32.mrf.mxu0 }
 0x1d2   : > { %v1082_v62 = vmul.f32 0.0078125, %v1079_v58 }
 0x1d4   : > { %1426 = vmatmul.msk.f32.vlgmr.msra.gmra.mxu3 %vm1121_vm11, %v1082_v62  ;;  %v1107_v59 = vmul.f32 %v1082_v62, %v1082_v62 }
 0x1db   : > { %v1103_v11 = vpop.f32.mrf.mxu2 }
 0x1dc   : > { %v1106_v0 = vmul.f32 0.0078125, %v1103_v11 }
 0x1de   : > { %v1108_v52 = vsub.f32 %v1106_v0, %v1107_v59 }
 0x1e0   : > { %v1109_v1 = vmax.f32 %v1108_v52, 0.0 }
 0x1e2   : > { %v1110_v2 = vadd.f32 1e-05, %v1109_v1 }
 0x1e4   : > { %1514 = vrsqrt.f32 %v1110_v2  ;;  %vm1117_vm8 = vweird.f32 %v1110_v2 }
 0x1ea   : > { %v1515_v4 = vpop.eup %1514 }
 0x1eb   : > { %v1112_v6 = vmul.f32 %v1515_v4, %v1110_v2  ;;  %vm1118_vm3 = vweird.f32 %v1515_v4 }
 0x1ec   : > { %vm1119_vm10 = vmor %vm1117_vm8, %vm1118_vm3 }
 0x1ed   : > { %v1113_v7 = vmul.f32 %v1515_v4, %v1112_v6 }
 0x1ef   : > { %v1114_v63 = vmul.f32 0.5, %v1113_v7 }
 0x1f1   : > { %v1115_v10 = vsub.f32 1.5, %v1114_v63 }
 0x1f3   : > { %v1116_v60 = vmul.f32 %v1515_v4, %v1115_v10 }
 0x1f5   : > { %v1120_v15 = vsel %vm1119_vm10, %v1515_v4, %v1116_v60 }
 0x1f6   : > { %1427 = vmatmul.msk.f32.vlgmr.msra.gmra.mxu0 %vm1121_vm11, %v1120_v15 }
 0x257   : > { %v1142_v18 = vpop.f32.mrf.mxu3 }
 0x258   : > { %v1169_v12 = vsub.f32 %v1020_v42, %v1142_v18 }
 0x273   : > { %v1165_v36 = vpop.f32.mrf.mxu0 }
 0x274   : > { %v1168_v17 = vmul.f32 %v1165_v36, %v1021_v13 }
 0x276   : > { %v1170_v8 = vmul.f32 %v1169_v12, %v1168_v17  ;;  %v1173_v3 = vperm.slane %v1168_v17, 0 }
 0x278   : > { %v1171_v9 = vadd.f32 %v1170_v8, %v1022_v19  ;;  %v1175_v29 = vmul.f32 %v1173_v3, %v2094_v24  ;;  %v1176_v20 = vmul.f32 %v1173_v3, %v2098_v31 }
 0x27a   : > { %v1178_v23 = vperm.slane %v1171_v9, 0 }
 0x27c   : > { %v1180_v25 = vadd.f32 %v1178_v23, %v1175_v29  ;;  %v1181_v26 = vadd.f32 %v1178_v23, %v1176_v20 }
 0x27e   : > { %v1182_v21 = vmax.f32 %v1180_v25, 0.0  ;;  %v1183_v27 = vmax.f32 %v1181_v26, 0.0 }
 0x280   : > { %v1184_v28 = vpack.c.bf16 %v1182_v21, %v1182_v21  ;;  %v1185_v30 = vpack.c.bf16 %v1183_v27, %v1183_v27 }
 0x282   : > { %1186 = vst.msk [vmem:[%s271_s13] sm:$0xf] %vm2205_vm12, %v1184_v28 }
 0x283   : > { %1187 = vst.msk [vmem:[%s271_s13 + $0x4] sm:$0xf] %vm2206_vm13, %v1185_v30 }
 0x284   : > { %1543 = shalt.err (!%p1540_p3)
}
 0x285   : > { %s1582_s18 = smov 4  }
 0x286   : > { %1472 = dma.vmem_to_hbm [thread:$0]  (%p1661_p5), %s1202_s14, 128, %s1204_s15, %s1189_s28, %s1581_s9, %s1581_s9, %s1582_s18  }
 0x287 PF: > { %p1478_p4 = scmp.ge.s32.totalorder %s1578_s27, 2  ;;  %s1218_s29 = sand.u32 1, %s1566_s24  }
 0x288   : > { %s1219_s8 = scalar_lea.sflag [#allocation4], %s1218_s29 }
 0x289   : > { %p1475_p7 = pnand %p1478_p4, %p1665_p6 }
 0x28b   : > { %p1476_p8 = pneg %p1475_p7 }
 0x28d   : > { %1561 = dma.done.wait (%p1476_p8), %s1219_s8, 128  }
 0x28e   : > { %1563 = vsyncadd (%p1476_p8), %s1219_s8, 4294967168  ;;  %p17_p9 = scmp.ge.s32.totalorder %s1648_s30, 4   ;;  %s2207_s24 = smov %s1570_s25 }
 0x28f   : > { %s2208_s25 = smov %s1574_s26  ;;  %s2209_s26 = smov %s1659_s10 }
 0x290   : > { %s2210_s27 = smov %s1648_s30  ;;  %19 = sbr.rel (!%p17_p9) target bundleno = 3 (0x3), region = 83 }
 0x295   :  { %1225 = vsyncpa [#allocation4], 1 }
 0x296   :  { %1227 = vsyncpa [#allocation4 + $0x1], 1 }

</bundles_post_ra>
